<compile_context>
chip_gen: v7x
topology: tpu7x:2x2x1
jax: 0.10.0
libtpu: 0.0.40
codegen_flags: <defaults>
</compile_context>

<pallas_src>
import math
from typing import NamedTuple

import jax
import jax.numpy as jnp
from jax.experimental import pallas as pl
from jax.experimental.pallas import tpu as pltpu

N_bead_type = 19
N_feature = 30
de = 32
dh = 64
K_TAIL = N_feature - N_bead_type     # 11
K_IN = de + K_TAIL                   # 43
LEAKY_SLOPE = 0.01                   # PyTorch F.leaky_relu default


class PackedParams(NamedTuple):
    """Folded + lane-packed parameters (compute once, reuse every call)."""
    pack: int
    w_types: jax.Array   # (19*pack, 64*pack) block-diagonal, embedding folded
    w_tail: jax.Array    # (11*pack, 64*pack) block-diagonal
    bias: jax.Array      # (1, 64*pack)


def prepare_params(embed_weight, embed_bias, fc_weight, fc_bias, *, pack=2,
                   dtype=jnp.float32):
    """Fold Linear(19->32) into Linear(43->64) and build block-diag packs.

    embed_weight: (19, 32)  -- nn.Linear weight already transposed to (in, out)
    embed_bias:   (32,)
    fc_weight:    (43, 64)  -- already transposed to (in, out)
    fc_bias:      (64,)
    pack:         rows packed per 128-lane output row (2 fits v5e's 128-MXU,
                  4 fills v6e/v7x's 256-MXU N dimension).
    """
    assert pack >= 1
    w_types = embed_weight @ fc_weight[:de]                   # (19, 64)
    w_tail = fc_weight[de:]                                    # (11, 64)
    b_fold = embed_bias @ fc_weight[:de] + fc_bias             # (64,)

    eye = jnp.eye(pack, dtype=dtype)
    w_types_p = jnp.kron(eye, w_types.astype(dtype))           # (19p, 64p)
    w_tail_p = jnp.kron(eye, w_tail.astype(dtype))             # (11p, 64p)
    b_p = jnp.tile(b_fold.astype(dtype).reshape(1, dh), (1, pack))  # (1, 64p)
    return PackedParams(pack=pack, w_types=w_types_p, w_tail=w_tail_p, bias=b_p)


def _fused_kernel(types_ref, tail_ref, wt_ref, wl_ref, b_ref, o_ref):
    # types_ref: (tm, 19p)  tail_ref: (tm, 11p)
    # wt_ref:    (19p, 64p) wl_ref:   (11p, 64p)  b_ref: (1, 64p)
    # o_ref:     (tm, 64p)
    y = jnp.dot(types_ref[...], wt_ref[...], preferred_element_type=jnp.float32)
    y = y + jnp.dot(tail_ref[...], wl_ref[...], preferred_element_type=jnp.float32)
    y = y + b_ref[...]
    # leaky_relu in f32 vregs; cast only at the final store.
    o_ref[...] = jnp.where(y > 0, y, LEAKY_SLOPE * y).astype(o_ref.dtype)


def _round_up(x, m):
    return -(-x // m) * m


def encoder_initial_hidden(types_NM, types_HB, types_PN, label_SI, label_SZ,
                           charge, delta_G, net_charge, params: PackedParams,
                           *, tm=2048, out_dtype=jnp.float32, tail=None):
    """leaky_relu(Linear43->64(concat(Linear19->32(types), tail_features))).

    params:   PackedParams from prepare_params() (hoisted out of the hot path).
    tm:       row tile in *packed* rows (>= a few thousand recommended; the
              kernel is HBM/step-overhead bound).
    out_dtype: explicit output dtype (bf16 halves writeback traffic).
    tail:     optionally pass the pre-packed (..., 11) feature slab directly to
              skip the wrapper concat round trip.
    """
    lead = types_NM.shape[:-1]
    M = math.prod(lead) if lead else 1
    if M == 0:
        return jnp.zeros((*lead, dh), out_dtype)

    pack = params.pack
    if tail is None:
        tail = jnp.concatenate([types_HB, types_PN, label_SI, label_SZ,
                                charge, delta_G, net_charge], axis=-1)
    assert tail.shape[-1] == K_TAIL, tail.shape

    types2 = types_NM.reshape(M, N_bead_type)
    tail2 = tail.reshape(M, K_TAIL)

    # Always take the lane-dense packed path: pad to a multiple of `pack`.
    # A few dummy rows are far cheaper than lane-masked stores on every row.
    pad = (-M) % pack
    if pad:
        types2 = jnp.concatenate(
            [types2, jnp.zeros((pad, N_bead_type), types2.dtype)], axis=0)
        tail2 = jnp.concatenate(
            [tail2, jnp.zeros((pad, K_TAIL), tail2.dtype)], axis=0)
    Mp = M + pad
    R = Mp // pack
    Ke, Kt, N = N_bead_type * pack, K_TAIL * pack, dh * pack

    types_p = types2.reshape(R, Ke)       # contiguous row-major repack
    tail_p = tail2.reshape(R, Kt)

    # Row tile: exact single block for small inputs (no padding / masking),
    # otherwise a large multiple of 8 to amortize ~0.35us per grid step.
    tm_rows = R if R <= tm else max(8, (tm // 8) * 8)
    grid = (pl.cdiv(R, tm_rows),)

    # VMEM budget from the actual lane-padded, double-buffered buffers.
    in_bytes = jnp.dtype(types_p.dtype).itemsize
    out_bytes = jnp.dtype(out_dtype).itemsize
    stream = 2 * tm_rows * (_round_up(Ke, 128) + _round_up(Kt, 128)) * in_bytes
    stream += 2 * tm_rows * _round_up(N, 128) * out_bytes
    vmem_limit = int(min(max(stream + (4 << 20), 16 << 20), 64 << 20))

    out = pl.pallas_call(
        _fused_kernel,
        out_shape=jax.ShapeDtypeStruct((R, N), out_dtype),
        grid_spec=pltpu.PrefetchScalarGridSpec(
            num_scalar_prefetch=0,
            grid=grid,
            in_specs=[
                pl.BlockSpec((tm_rows, Ke), lambda i: (i, 0)),
                pl.BlockSpec((tm_rows, Kt), lambda i: (i, 0)),
                pl.BlockSpec((Ke, N), lambda i: (0, 0)),   # resident weight
                pl.BlockSpec((Kt, N), lambda i: (0, 0)),   # resident weight
                pl.BlockSpec((1, N), lambda i: (0, 0)),    # resident bias
            ],
            out_specs=pl.BlockSpec((tm_rows, N), lambda i: (i, 0)),
        ),
        compiler_params=pltpu.CompilerParams(
            dimension_semantics=("parallel",),
            vmem_limit_bytes=vmem_limit),
    )(types_p, tail_p, params.w_types, params.w_tail, params.bias)

    return out.reshape(Mp, dh)[:M].reshape(*lead, dh)


def _reference(types_NM, hb, pn, si, sz, ch, dg, nc, ew, eb, fw, fb):
    emb = types_NM @ ew + eb
    x = jnp.concatenate([emb, hb, pn, si, sz, ch, dg, nc], axis=-1)
    y = x @ fw + fb
    return jnp.where(y > 0, y, LEAKY_SLOPE * y)


def _make_inputs(key, lead_shape):
    ks = jax.random.split(key, 8)

    def n(k, f):
        return jax.random.normal(k, (*lead_shape, f), jnp.float32)

    return (n(ks[0], N_bead_type), n(ks[1], 2), n(ks[2], 2), n(ks[3], 2),
            n(ks[4], 2), n(ks[5], 1), n(ks[6], 1), n(ks[7], 1))


if __name__ == "__main__":
    key = jax.random.PRNGKey(0)
    k_in, k_ew, k_eb, k_fw, k_fb = jax.random.split(key, 5)

    # Deterministic Linear(19->32) and Linear(43->64) params, (in, out) layout.
    b1 = 1.0 / jnp.sqrt(N_bead_type)
    embed_weight = jax.random.uniform(k_ew, (N_bead_type, de), jnp.float32, -b1, b1)
    embed_bias = jax.random.uniform(k_eb, (de,), jnp.float32, -b1, b1)
    b2 = 1.0 / jnp.sqrt(K_IN)
    fc_weight = jax.random.uniform(k_fw, (K_IN, dh), jnp.float32, -b2, b2)
    fc_bias = jax.random.uniform(k_fb, (dh,), jnp.float32, -b2, b2)

    # Hoisted weight packing (done once, reused for every call below).
    params2 = prepare_params(embed_weight, embed_bias, fc_weight, fc_bias, pack=2)
    params4 = prepare_params(embed_weight, embed_bias, fc_weight, fc_bias, pack=4)

    def check(feats, out, tol):
        ref = _reference(*feats, embed_weight, embed_bias, fc_weight, fc_bias)
        assert out.shape == ref.shape, (out.shape, ref.shape)
        assert jnp.allclose(out.astype(jnp.float32), ref, atol=tol, rtol=tol), \
            float(jnp.max(jnp.abs(out.astype(jnp.float32) - ref)))

    # 1) Main case: 2 molecules x 8 beads (M=16, single exact packed block).
    feats = _make_inputs(k_in, (2, 8))
    out = encoder_initial_hidden(*feats, params2)
    jax.block_until_ready(out)
    assert out.shape == (2, 8, dh)
    check(feats, out, 1e-3)

    # 2) Partial final tile: M=44 -> R=22, tm=8 -> grid=3, last block of 6 rows.
    feats_pt = _make_inputs(jax.random.PRNGKey(1), (1, 44))
    out_pt = encoder_initial_hidden(*feats_pt, params2, tm=8)
    check(feats_pt, out_pt, 1e-3)

    # 3) Odd row count: padded to even, still lane-dense 128-wide stores.
    feats_odd = _make_inputs(jax.random.PRNGKey(2), (1, 15))
    out_odd = encoder_initial_hidden(*feats_odd, params2)
    check(feats_odd, out_odd, 1e-3)

    # 4) pack=4 path (256-lane output, fills v6e/v7x MXU N dimension).
    feats4 = _make_inputs(jax.random.PRNGKey(3), (2, 32))
    out4 = encoder_initial_hidden(*feats4, params4)
    check(feats4, out4, 1e-3)

    # 5) bf16 writeback path (f32 accumulation, cast only at the store).
    out_bf16 = encoder_initial_hidden(*feats, params2, out_dtype=jnp.bfloat16)
    assert out_bf16.dtype == jnp.bfloat16
    check(feats, out_bf16, 5e-2)

    # 6) M == 0 edge case is guarded.
    feats0 = _make_inputs(jax.random.PRNGKey(4), (0,))
    out0 = encoder_initial_hidden(*feats0, params2)
    assert out0.shape == (0, dh)

    jax.block_until_ready((out, out_pt, out_odd, out4, out_bf16, out0))
    print("KERNEL_OK")
</pallas_src>

<mosaic_0001>
module attributes {stable_mosaic.version = 11 : i64} {
  func.func @_fused_kernel(%arg0: i32, %arg1: memref<8x38xf32, #tpu.memory_space<vmem>>, %arg2: memref<8x22xf32, #tpu.memory_space<vmem>>, %arg3: memref<38x128xf32, #tpu.memory_space<vmem>>, %arg4: memref<22x128xf32, #tpu.memory_space<vmem>>, %arg5: memref<1x128xf32, #tpu.memory_space<vmem>>, %arg6: memref<8x128xf32, #tpu.memory_space<vmem>>) attributes {dimension_semantics = [#tpu.dimension_semantics<parallel>], iteration_bounds = array<i64: 1>, scalar_prefetch = 0 : i64, scratch_operands = 0 : i64, tpu.core_type = #tpu.core_type<tc>, window_params = [{transform_indices = @transform_0, window_bounds = array<i64: 8, 38>}, {transform_indices = @transform_1, window_bounds = array<i64: 8, 22>}, {pipeline_mode = #tpu.pipeline_mode<synchronous>, transform_indices = @transform_2, window_bounds = array<i64: 38, 128>}, {pipeline_mode = #tpu.pipeline_mode<synchronous>, transform_indices = @transform_3, window_bounds = array<i64: 22, 128>}, {pipeline_mode = #tpu.pipeline_mode<synchronous>, transform_indices = @transform_4, window_bounds = array<i64: 1, 128>}, {transform_indices = @transform_5, window_bounds = array<i64: 8, 128>}]} {
    %c0 = arith.constant 0 : index
    %c0_0 = arith.constant 0 : index
    %0 = vector.load %arg1[%c0, %c0_0] : memref<8x38xf32, #tpu.memory_space<vmem>>, vector<8x38xf32>
    %c0_1 = arith.constant 0 : index
    %c0_2 = arith.constant 0 : index
    %1 = vector.load %arg3[%c0_1, %c0_2] : memref<38x128xf32, #tpu.memory_space<vmem>>, vector<38x128xf32>
    %cst = arith.constant dense<0.000000e+00> : vector<8x128xf32>
    %2 = tpu.matmul %0, %1, %cst {dimension_numbers = #tpu.dot_dimension_numbers<[1], [0], [0], [1], [0, 0, 1, 1], [], []>} : vector<8x38xf32>, vector<38x128xf32>, vector<8x128xf32> -> vector<8x128xf32>
    %c0_3 = arith.constant 0 : index
    %c0_4 = arith.constant 0 : index
    %3 = vector.load %arg2[%c0_3, %c0_4] : memref<8x22xf32, #tpu.memory_space<vmem>>, vector<8x22xf32>
    %c0_5 = arith.constant 0 : index
    %c0_6 = arith.constant 0 : index
    %4 = vector.load %arg4[%c0_5, %c0_6] : memref<22x128xf32, #tpu.memory_space<vmem>>, vector<22x128xf32>
    %cst_7 = arith.constant dense<0.000000e+00> : vector<8x128xf32>
    %5 = tpu.matmul %3, %4, %cst_7 {dimension_numbers = #tpu.dot_dimension_numbers<[1], [0], [0], [1], [0, 0, 1, 1], [], []>} : vector<8x22xf32>, vector<22x128xf32>, vector<8x128xf32> -> vector<8x128xf32>
    %6 = arith.addf %2, %5 : vector<8x128xf32>
    %c0_8 = arith.constant 0 : index
    %c0_9 = arith.constant 0 : index
    %7 = vector.load %arg5[%c0_8, %c0_9] : memref<1x128xf32, #tpu.memory_space<vmem>>, vector<1x128xf32>
    %8 = vector.broadcast %7 : vector<1x128xf32> to vector<8x128xf32>
    %9 = arith.addf %6, %8 : vector<8x128xf32>
    %cst_10 = arith.constant 0.000000e+00 : f32
    %10 = vector.broadcast %cst_10 : f32 to vector<8x128xf32>
    %11 = arith.cmpf ogt, %9, %10 : vector<8x128xf32>
    %cst_11 = arith.constant 0.00999999977 : f32
    %12 = vector.broadcast %cst_11 : f32 to vector<8x128xf32>
    %13 = arith.mulf %12, %9 : vector<8x128xf32>
    %14 = arith.select %11, %9, %13 : vector<8x128xi1>, vector<8x128xf32>
    %c0_12 = arith.constant 0 : index
    %c0_13 = arith.constant 0 : index
    %15 = vector.load %arg6[%c0_12, %c0_13] : memref<8x128xf32, #tpu.memory_space<vmem>>, vector<8x128xf32>
    tpu.vector_store %arg6[%c0_12, %c0_13], %14 {strides = array<i32>} : memref<8x128xf32, #tpu.memory_space<vmem>>, vector<8x128xf32>,
    return
  }
  func.func @transform_0(%arg0: i32) -> (i32, i32) {
    %c0_i32 = arith.constant 0 : i32
    %c0_i32_0 = arith.constant 0 : i32
    return %arg0, %c0_i32 : i32, i32
  }
  func.func @transform_1(%arg0: i32) -> (i32, i32) {
    %c0_i32 = arith.constant 0 : i32
    %c0_i32_0 = arith.constant 0 : i32
    return %arg0, %c0_i32 : i32, i32
  }
  func.func @transform_2(%arg0: i32) -> (i32, i32) {
    %c0_i32 = arith.constant 0 : i32
    %c0_i32_0 = arith.constant 0 : i32
    %c0_i32_1 = arith.constant 0 : i32
    return %c0_i32, %c0_i32_0 : i32, i32
  }
  func.func @transform_3(%arg0: i32) -> (i32, i32) {
    %c0_i32 = arith.constant 0 : i32
    %c0_i32_0 = arith.constant 0 : i32
    %c0_i32_1 = arith.constant 0 : i32
    return %c0_i32, %c0_i32_0 : i32, i32
  }
  func.func @transform_4(%arg0: i32) -> (i32, i32) {
    %c0_i32 = arith.constant 0 : i32
    %c0_i32_0 = arith.constant 0 : i32
    %c0_i32_1 = arith.constant 0 : i32
    return %c0_i32, %c0_i32_0 : i32, i32
  }
  func.func @transform_5(%arg0: i32) -> (i32, i32) {
    %c0_i32 = arith.constant 0 : i32
    %c0_i32_0 = arith.constant 0 : i32
    return %arg0, %c0_i32 : i32, i32
  }
}

</mosaic_0001>

<bundles_post_ra>
// kernel: tpu_custom_call.1
= control target key start
LH: loop header
LB: loop body
LE: loop exit
PB: predicated region body
PF: predicated region fallthrough
CT: control target
= control target key end

     0   :  { %10 = vsyncpa [#allocation3], 0  ;;  %s543_s0 = inlined_call_operand.hbm [shape: f32[8,38], index: 0, kind: input, shape index: {}]   ;;  %s544_s1 = inlined_call_operand.hbm [shape: f32[8,22], index: 1, kind: input, shape index: {}]   ;;  %s545_s2 = inlined_call_operand.hbm [shape: f32[38,128], index: 2, kind: input, shape index: {}]   ;;  %s546_s3 = inlined_call_operand.hbm [shape: f32[22,128], index: 3, kind: input, shape index: {}]   ;;  %s547_s4 = inlined_call_operand.vmem [shape: f32[1,128], index: 4, kind: input, shape index: {}]   ;;  %s548_s5 = inlined_call_operand.hbm [shape: f32[8,128], index: 5, kind: output, shape index: {}]  }
   0x1   :  { %11 = vsyncpa [#allocation6], 0 }
   0x2   :  { %12 = vsyncpa [#allocation9], 0 }
   0x3   :  { %13 = vsyncpa [#allocation4], 0  ;;  %s440_s18 = smov [#allocation5]   ;;  %s441_s20 = smov [#allocation2]  }
   0x4   :  { %s30_s19 = sshll.u32 %s440_s18, 4  ;;  %s20_s21 = sshll.u32 %s441_s20, 4  ;;  %s31_s19 = int_to_ptr.vmem [resolvable:$true] %s30_s19  ;;  %s21_s21 = int_to_ptr.vmem [resolvable:$true] %s20_s21 }
   0x5   :  { %s322_s24 = scalar_lea.hbm %s544_s1, 128 }
   0x6   :  { %p323_p0 = scmp.ne.s32.totalorder %s544_s1, %s322_s24  ;;  %p326_p1 = scmp.lt.u32.totalorder %s322_s24, %s544_s1 }
   0x8   :  { %p328_p2 = pnand %p326_p1, %p323_p0 }
   0xa   :  { %331 = shalt.err (!%p328_p2)
}
   0xb   :  { %s332_s29 = scalar_lea.vmem %s31_s19, 128  ;;  %p337_p4 = scmp.lt.s32.totalorder %s31_s19, %s31_s19 }
   0xc   :  { %p333_p3 = scmp.ne.s32.totalorder %s31_s19, %s332_s29  ;;  %p338_p5 = scmp.lt.s32.totalorder %s332_s29, %s332_s29 }
   0xe   :  { %p339_p6 = por %p338_p5, %p337_p4 }
  0x10   :  { %p340_p7 = pnand %p339_p6, %p333_p3 }
  0x12   :  { %343 = shalt.err (!%p340_p7)
}
  0x13   :  { %33 = dma.hbm_to_vmem [thread:$0]  %s544_s1, 128, %s31_s19, [#allocation6]  }
  0x14   :  { %s344_s9 = scalar_lea.hbm %s543_s0, 128 }
  0x15   :  { %p345_p8 = scmp.ne.s32.totalorder %s543_s0, %s344_s9  ;;  %p348_p9 = scmp.lt.u32.totalorder %s344_s9, %s543_s0 }
  0x17   :  { %p350_p10 = pnand %p348_p9, %p345_p8 }
  0x19   :  { %353 = shalt.err (!%p350_p10)
}
  0x1a   :  { %s354_s14 = scalar_lea.vmem %s21_s21, 128  ;;  %p359_p12 = scmp.lt.s32.totalorder %s21_s21, %s21_s21 }
  0x1b   :  { %p355_p11 = scmp.ne.s32.totalorder %s21_s21, %s354_s14  ;;  %p360_p13 = scmp.lt.s32.totalorder %s354_s14, %s354_s14 }
  0x1d   :  { %p361_p0 = por %p360_p13, %p359_p12 }
  0x1f   :  { %p362_p1 = pnand %p361_p0, %p355_p11 }
  0x21   :  { %365 = shalt.err (!%p362_p1)
}
  0x22   :  { %23 = dma.hbm_to_vmem [thread:$0]  %s543_s0, 128, %s21_s21, [#allocation3]  }
  0x23   :  { %s442_s16 = smov [#allocation7]   ;;  %s366_s20 = scalar_lea.hbm %s545_s2, 640 }
  0x24   :  { %s39_s17 = sshll.u32 %s442_s16, 4  ;;  %p367_p2 = scmp.ne.s32.totalorder %s545_s2, %s366_s20  ;;  %s40_s17 = int_to_ptr.vmem [resolvable:$true] %s39_s17 }
  0x25   :  { %p370_p3 = scmp.lt.u32.totalorder %s366_s20, %s545_s2 }
  0x27   :  { %p372_p4 = pnand %p370_p3, %p367_p2 }
  0x29   :  { %375 = shalt.err (!%p372_p4)
}
  0x2a   :  { %s376_s26 = scalar_lea.vmem %s40_s17, 640  ;;  %p381_p6 = scmp.lt.s32.totalorder %s40_s17, %s40_s17 }
  0x2b   :  { %p377_p5 = scmp.ne.s32.totalorder %s40_s17, %s376_s26  ;;  %p382_p7 = scmp.lt.s32.totalorder %s376_s26, %s376_s26 }
  0x2d   :  { %p383_p8 = por %p382_p7, %p381_p6 }
  0x2f   :  { %p384_p9 = pnand %p383_p8, %p377_p5 }
  0x31   :  { %387 = shalt.err (!%p384_p9)
}
  0x32   :  { %s443_s0 = smov 128   ;;  %s444_s21 = smov 8  }
  0x33   :  { %45 = dma.hbm_to_vmem [thread:$0]  %s545_s2, 640, %s40_s17, [#allocation6], %s443_s0, %s443_s0, %s444_s21  }
  0x34   :  { %s445_s29 = smov [#allocation8]   ;;  %s388_s8 = scalar_lea.hbm %s546_s3, 384 }
  0x35   :  { %s51_s30 = sshll.u32 %s445_s29, 4  ;;  %p389_p10 = scmp.ne.s32.totalorder %s546_s3, %s388_s8  ;;  %s52_s30 = int_to_ptr.vmem [resolvable:$true] %s51_s30 }
  0x36   :  { %p392_p11 = scmp.lt.u32.totalorder %s388_s8, %s546_s3 }
  0x38   :  { %p394_p12 = pnand %p392_p11, %p389_p10 }
  0x3a   :  { %397 = shalt.err (!%p394_p12)
}
  0x3b   :  { %s398_s13 = scalar_lea.vmem %s52_s30, 384  ;;  %p403_p0 = scmp.lt.s32.totalorder %s52_s30, %s52_s30 }
  0x3c   :  { %p399_p13 = scmp.ne.s32.totalorder %s52_s30, %s398_s13  ;;  %p404_p1 = scmp.lt.s32.totalorder %s398_s13, %s398_s13 }
  0x3e   :  { %p405_p2 = por %p404_p1, %p403_p0 }
  0x40   :  { %p406_p3 = pnand %p405_p2, %p399_p13 }
  0x42   :  { %409 = shalt.err (!%p406_p3)
}
  0x43   :  { %57 = dma.hbm_to_vmem [thread:$0]  %s546_s3, 384, %s52_s30, [#allocation9], %s443_s0, %s443_s0, %s444_s21  }
  0x44   :  { %432 = dma.done.wait [#allocation3], 128  }
  0x45   :  { %433 = vsyncadd [#allocation3], 4294967168 }
  0x46   :  { %434 = dma.done.wait [#allocation6], 768  }
  0x47   :  { %435 = vsyncadd [#allocation6], 4294966528 }
  0x48   :  { %436 = dma.done.wait [#allocation9], 384  }
  0x49   :  { %437 = vsyncadd [#allocation9], 4294966912  ;;  %v446_v0 = vmov 0.0|0.0   ;;  %vm447_vm0 = vmmov 0   ;;  %v448_v1 = vmov 0.0   ;;  %v73_v2 = vld [vmem:[#allocation7] sm:$0xff] }
  0x4a   :  { %306 = vmatprep.subr.bf16.mxu1 %v446_v0  ;;  %303 = vmatprep.subr.bf16.mxu0 %v446_v0  ;;  %v74_v3 = vld [vmem:[#allocation7 + $0x8] sm:$0xff]  ;;  %v80_v6 = vld [vmem:[#allocation8 + $0x8] sm:$0xff]  ;;  %v76_v8 = vld [vmem:[#allocation7 + $0x18] sm:$0xff]  ;;  %vm86_vm1 = vcmask 1045504   ;;  %vm82_vm2 = vcmask 179200   ;;  %vm160_vm3 = vcmask 310272  }
  0x4b   :  { %287 = vmatprep.mubr.msk.f32.mxu0 %vm447_vm0, %v448_v1  ;;  %300 = vmatprep.mubr.msk.f32.mxu1 %vm447_vm0, %v448_v1  ;;  %v79_v4 = vld [vmem:[#allocation8] sm:$0xff]  ;;  %v307_v5 = vpack.c.bf16 %v74_v3, %v73_v2  ;;  %v75_v7 = vld [vmem:[#allocation7 + $0x10] sm:$0xff]  ;;  %v81_v11 = vld [vmem:[#allocation8 + $0x10] sm:$0x3f]  ;;  %s449_s15 = smov [#allocation10]  }
  0x4c   :  { %v304_v9 = vpack.c.bf16 %v80_v6, %v79_v4  ;;  %v310_v10 = vpack.c.bf16 %v76_v8, %v75_v7  ;;  %v78_v12 = vld [vmem:[#allocation5] sm:$0xff]  ;;  %v77_v13 = vld [vmem:[#allocation7 + $0x20] sm:$0x3f]  ;;  %v72_v14 = vld [vmem:[#allocation2] sm:$0xff]  ;;  %s255_s16 = sshll.u32 %s449_s15, 4  ;;  %s256_s16 = int_to_ptr.vmem [resolvable:$true] %s255_s16 }
  0x4d   :  { %308 = vmatpush3.bf16.msra.mxu1 %v307_v5  ;;  %v270_v18 = vld [vmem:[%s547_s4] ss:$0 sm:$0xff]  ;;  %s410_s17 = scalar_lea.vmem %s256_s16, 128  ;;  %p415_p5 = scmp.lt.s32.totalorder %s256_s16, %s256_s16 }
  0x4e   :  { %305 = vmatpush3.bf16.msra.mxu0 %v304_v9  ;;  %309 = vmatprep.subr.bf16.mxu1 %v446_v0  ;;  %p411_p4 = scmp.ne.s32.totalorder %s256_s16, %s410_s17  ;;  %p416_p6 = scmp.lt.s32.totalorder %s410_s17, %s410_s17 }
  0x4f   :  { %285 = vmatprep.subr.mxu0 %v448_v1 }
  0x50   :  { %p417_p7 = por %p416_p6, %p415_p5 }
  0x51   :  { %311 = vmatpush3.bf16.msra.mxu1 %v310_v10 }
  0x52   :  { %286 = vmatpush3.msk.msra.mxu0 %vm86_vm1, %v81_v11  ;;  %298 = vmatprep.subr.mxu1 %v448_v1  ;;  %p418_p8 = pnand %p417_p7, %p411_p4 }
  0x53   :  { %288 = vmatmul.mubr.msk.f32.vlgmr.msra.gmra.mrb[0].mxu0 %vm82_vm2, %v78_v12 }
  0x55   :  { %299 = vmatpush3.msk.msra.mxu1 %vm86_vm1, %v77_v13 }
  0x56   :  { %301 = vmatmul.mubr.msk.f32.vlgmr.msra.gmra.mrb[0].mxu1 %vm160_vm3, %v72_v14 }
 0x126   :  { %v156_v15 = vpop.f32.mrb[0].mxu0 }
 0x127   :  { %v289_v16 = vpop.f32.mrb[1].mxu0 }
 0x129   :  { %v233_v17 = vpop.f32.mrb[0].mxu1 }
 0x12a   :  { %v234_v19 = vadd.f32 %v233_v17, %v156_v15  ;;  %v302_v20 = vpop.f32.mrb[1].mxu1 }
 0x12c   :  { %v244_v21 = vadd.f32 %v270_v18, %v234_v19 }
 0x12e   :  { %v246_v22 = vmul.f32 0.01, %v244_v21  ;;  %vm245_vm4 = vcmp.gt.f32.partialorder %v244_v21, 0.0 }
 0x130   :  { %v247_v23 = vsel %vm245_vm4, %v244_v21, %v246_v22 }
 0x131   :  { %248 = vst [vmem:[#allocation10] sm:$0xff] %v247_v23 }
 0x132   :  { %421 = shalt.err (!%p418_p8)
}
 0x133   :  { %s422_s4 = scalar_lea.hbm %s548_s5, 128 }
 0x134   :  { %p423_p9 = scmp.ne.s32.totalorder %s548_s5, %s422_s4  ;;  %p426_p10 = scmp.lt.u32.totalorder %s422_s4, %s548_s5 }
 0x136   :  { %p428_p11 = pnand %p426_p10, %p423_p9 }
 0x138   :  { %431 = shalt.err (!%p428_p11)
}
 0x139   :  { %258 = dma.vmem_to_hbm [thread:$0]  %s256_s16, 128, %s548_s5, [#allocation4]  }
 0x13a   :  { %438 = dma.done.wait [#allocation4], 128  }
 0x13b   :  { %439 = vsyncadd [#allocation4], 4294967168 }
 0x13c   :  { %262 = vsyncpa [#allocation3], 1 }
 0x13d   :  { %263 = vsyncpa [#allocation6], 1 }
 0x13e   :  { %264 = vsyncpa [#allocation9], 1 }
 0x13f   :  { %265 = vsyncpa [#allocation4], 1 }

</bundles_post_ra>
